<compile_context>
chip_gen: v6e
topology: v6e:2x2x1
jax: 0.10.0
libtpu: 0.0.40
codegen_flags: <defaults>
</compile_context>

<pallas_src>
import functools
import math

import jax
import jax.numpy as jnp
from jax.experimental import pallas as pl
from jax.experimental.pallas import tpu as pltpu

_GELU_C = math.sqrt(2.0 / math.pi)


def _round_up(a, b):
    return ((a + b - 1) // b) * b


def _tpu_generation():
    try:
        kind = jax.devices()[0].device_kind.lower()
    except Exception:
        return "unknown"
    if "v5 lite" in kind or "v5e" in kind or "v5litepod" in kind:
        return "v5e"
    if "v6" in kind:
        return "v6e"
    if "v7" in kind:
        return "v7x"
    return "unknown"


# Per-generation defaults; see module docstring for the roofline reasoning.
_GEN_CFG = {
    "v5e":     dict(block_m=256,  block_h=512, vmem_limit=48 << 20, gelu_bf16=False),
    "v6e":     dict(block_m=1024, block_h=512, vmem_limit=96 << 20, gelu_bf16=True),
    "v7x":     dict(block_m=512,  block_h=512, vmem_limit=52 << 20, gelu_bf16=True),
    "unknown": dict(block_m=256,  block_h=512, vmem_limit=48 << 20, gelu_bf16=False),
}


def _pick_th(H, block_h):
    """Largest 128-multiple divisor of H that is <= block_h (full H only if H < 128-aligned)."""
    if H % 128 != 0:
        return H                      # tiny / odd hidden dims only; full tile is then small
    th = (min(block_h, H) // 128) * 128
    while th > 128 and H % th != 0:
        th -= 128
    return th if H % th == 0 else H


def _new_gelu(h):
    # 0.5*h*(1 + tanh(sqrt(2/pi)*(h + 0.044715*h^3))), factored to save one VPU multiply.
    h2 = h * h
    return 0.5 * h * (1.0 + jnp.tanh(_GELU_C * h * (1.0 + 0.044715 * h2)))


def _mlp_kernel_acc_in_out(x_ref, wfc_ref, bfc_ref, wproj_ref, bproj_ref, o_ref,
                           *, gelu_bf16):
    """Variant for f32 output: accumulate directly into the resident output block."""
    j = pl.program_id(1)

    @pl.when(j == 0)
    def _init():
        o_ref[...] = jnp.zeros(o_ref.shape, dtype=o_ref.dtype)

    x_bf = x_ref[...].astype(jnp.bfloat16)                    # in-kernel cast (VPU)
    h = jnp.dot(x_bf, wfc_ref[...], preferred_element_type=jnp.float32)
    h = h + bfc_ref[...]                                      # f32 bias add
    if gelu_bf16:                                             # v6e/v7x: bf16 VPU/EUP path
        h = h.astype(jnp.bfloat16)
    g = _new_gelu(h)

    o_ref[...] += jnp.dot(g.astype(jnp.bfloat16), wproj_ref[...],
                          preferred_element_type=jnp.float32)

    @pl.when(j == pl.num_programs(1) - 1)
    def _finalize():
        o_ref[...] = o_ref[...] + bproj_ref[...]              # b_proj applied exactly once
        # TODO(synk): training-mode dropout (stochastic masking) not applied; inference identity.


def _mlp_kernel_acc_scratch(x_ref, wfc_ref, bfc_ref, wproj_ref, bproj_ref, o_ref,
                            acc_ref, *, gelu_bf16):
    """Variant for non-f32 outputs: f32 scratch accumulator, cast on finalize."""
    j = pl.program_id(1)

    @pl.when(j == 0)
    def _init():
        acc_ref[...] = jnp.zeros(acc_ref.shape, dtype=acc_ref.dtype)

    x_bf = x_ref[...].astype(jnp.bfloat16)
    h = jnp.dot(x_bf, wfc_ref[...], preferred_element_type=jnp.float32)
    h = h + bfc_ref[...]
    if gelu_bf16:
        h = h.astype(jnp.bfloat16)
    g = _new_gelu(h)

    acc_ref[...] += jnp.dot(g.astype(jnp.bfloat16), wproj_ref[...],
                            preferred_element_type=jnp.float32)

    @pl.when(j == pl.num_programs(1) - 1)
    def _finalize():
        o_ref[...] = (acc_ref[...] + bproj_ref[...]).astype(o_ref.dtype)
        # TODO(synk): training-mode dropout (stochastic masking) not applied; inference identity.


def mlp_forward(x, w_fc, b_fc, w_proj, b_proj, *,
                block_m=None, block_h=None, vmem_limit_bytes=None, gelu_bf16=None):
    """x: (B, T, C).  w_fc: (C, 4C), w_proj: (4C, C) -- stored transposed to (in, out).
    b_fc: (1, 4C), b_proj: (1, C)."""
    gen = _tpu_generation()
    cfg = _GEN_CFG[gen]
    block_m = cfg["block_m"] if block_m is None else block_m
    block_h = cfg["block_h"] if block_h is None else block_h
    vmem_limit_bytes = cfg["vmem_limit"] if vmem_limit_bytes is None else vmem_limit_bytes
    gelu_bf16 = cfg["gelu_bf16"] if gelu_bf16 is None else gelu_bf16

    B, T, C = x.shape
    H = w_fc.shape[1]                                  # 4*C
    M = B * T
    out_dtype = x.dtype
    out_itemsize = jnp.dtype(out_dtype).itemsize
    use_out_acc = (jnp.dtype(out_dtype) == jnp.dtype(jnp.float32))

    # --- hidden tile: largest 128-aligned divisor of H (keeps weight streaming bounded).
    th = _pick_th(H, block_h)

    # --- M tile: big for MXU occupancy, clamped for tiny shapes, shrunk if VMEM-tight.
    bm = min(block_m, _round_up(M, 8))

    def _vmem_need(bm_):
        inp = 2 * (bm_ * C * x.dtype.itemsize          # x tile (double-buffered)
                   + C * th * 2 + th * C * 2           # bf16 weight tiles (double-buffered)
                   + th * 4 + C * 4)                   # bias tiles
        out = 2 * bm_ * C * out_itemsize               # output block
        acc = 0 if use_out_acc else bm_ * C * 4        # separate f32 accumulator
        tmp = 3 * bm_ * th * (2 if gelu_bf16 else 4)   # h / h^2 / g live temporaries (rough)
        return inp + out + acc + tmp

    while bm > 128 and _vmem_need(bm) > int(0.8 * vmem_limit_bytes):
        bm = max(128, bm // 2)

    M_pad = _round_up(M, bm)
    if gen == "v7x" and (M_pad // bm) > 1 and (M_pad // bm) % 2 != 0:
        # keep both TensorCores busy when the parallel M axis is sharded across them
        M_pad = _round_up(M, 2 * bm)

    x2d = x.reshape(M, C)
    if M_pad != M:
        x2d = jnp.pad(x2d, ((0, M_pad - M), (0, 0)))

    # Weights bf16 at rest (MXU operands); biases in f32.  x keeps its dtype (cast in-kernel).
    w_fc = w_fc.astype(jnp.bfloat16)
    w_proj = w_proj.astype(jnp.bfloat16)
    b_fc = b_fc.astype(jnp.float32)
    b_proj = b_proj.astype(jnp.float32)

    n_m = M_pad // bm
    n_h = H // th
    grid = (n_m, n_h)

    cost = pl.CostEstimate(
        flops=4 * M_pad * C * H,                       # two matmuls
        transcendentals=M_pad * H,                     # tanh per hidden element
        bytes_accessed=(M_pad * C * x2d.dtype.itemsize                    # x read once
                        + n_m * (C * H + H * C) * 2                       # weights re-streamed per M tile
                        + n_m * (H + C) * 4                               # biases per M tile
                        + M_pad * C * out_itemsize),                      # output write
    )

    if use_out_acc:
        kernel = functools.partial(_mlp_kernel_acc_in_out, gelu_bf16=gelu_bf16)
        scratch_shapes = []
    else:
        kernel = functools.partial(_mlp_kernel_acc_scratch, gelu_bf16=gelu_bf16)
        scratch_shapes = [pltpu.VMEM((bm, C), jnp.float32)]

    out2d = pl.pallas_call(
        kernel,
        out_shape=jax.ShapeDtypeStruct((M_pad, C), out_dtype),
        grid_spec=pltpu.PrefetchScalarGridSpec(
            num_scalar_prefetch=0,
            grid=grid,
            in_specs=[
                pl.BlockSpec((bm, C), lambda i, j: (i, 0)),    # x rows (same for all j)
                pl.BlockSpec((C, th), lambda i, j: (0, j)),    # W_fc column tile
                pl.BlockSpec((1, th), lambda i, j: (0, j)),    # b_fc tile
                pl.BlockSpec((th, C), lambda i, j: (j, 0)),    # W_proj row tile
                pl.BlockSpec((1, C), lambda i, j: (0, 0)),     # b_proj (finalize only)
            ],
            out_specs=pl.BlockSpec((bm, C), lambda i, j: (i, 0)),
            scratch_shapes=scratch_shapes,
        ),
        compiler_params=pltpu.CompilerParams(
            dimension_semantics=("parallel", "arbitrary"),
            vmem_limit_bytes=vmem_limit_bytes,
        ),
        cost_estimate=cost,
    )(x2d, w_fc, b_fc, w_proj, b_proj)

    if M_pad != M:
        out2d = out2d[:M]
    return out2d.reshape(B, T, C)


def _reference(x, w_fc, b_fc, w_proj, b_proj):
    c = math.sqrt(2.0 / math.pi)
    h = jnp.einsum("btc,ch->bth", x, w_fc) + b_fc[0]
    g = 0.5 * h * (1.0 + jnp.tanh(c * (h + 0.044715 * h ** 3)))
    return jnp.einsum("bth,hc->btc", g, w_proj) + b_proj[0]


if __name__ == "__main__":
    # Small shapes consistent with the module: n_embd=128, batch=2, seq=8
    B, T, C = 2, 8, 128
    H = 4 * C

    key = jax.random.PRNGKey(0)
    kx, k1, k2, k3, k4 = jax.random.split(key, 5)

    x = jax.random.normal(kx, (B, T, C), dtype=jnp.float32)

    # Deterministic param init (torch Linear default: U(-1/sqrt(fan_in), 1/sqrt(fan_in)))
    bnd_fc = 1.0 / math.sqrt(C)
    bnd_pr = 1.0 / math.sqrt(H)
    # stored transposed: (in, out)
    w_fc = jax.random.uniform(k1, (C, H), jnp.float32, -bnd_fc, bnd_fc)
    b_fc = jax.random.uniform(k2, (1, H), jnp.float32, -bnd_fc, bnd_fc)
    w_proj = jax.random.uniform(k3, (H, C), jnp.float32, -bnd_pr, bnd_pr)
    b_proj = jax.random.uniform(k4, (1, C), jnp.float32, -bnd_pr, bnd_pr)

    out = mlp_forward(x, w_fc, b_fc, w_proj, b_proj)
    out = jax.block_until_ready(out)

    ref = _reference(x, w_fc, b_fc, w_proj, b_proj)
    assert out.shape == (B, T, C)
    # bf16 MXU inputs (f32 accumulation) -> loosened tolerance vs f32 reference.
    assert jnp.allclose(out, ref, atol=2e-2, rtol=2e-2), "mismatch vs reference"

    print("KERNEL_OK")
</pallas_src>

<mosaic_0001>
module attributes {stable_mosaic.version = 11 : i64} {
  func.func @_mlp_kernel_acc_in_out(%arg0: i32, %arg1: i32, %arg2: memref<16x128xf32, #tpu.memory_space<vmem>>, %arg3: memref<128x512xbf16, #tpu.memory_space<vmem>>, %arg4: memref<1x512xf32, #tpu.memory_space<vmem>>, %arg5: memref<512x128xbf16, #tpu.memory_space<vmem>>, %arg6: memref<1x128xf32, #tpu.memory_space<vmem>>, %arg7: memref<16x128xf32, #tpu.memory_space<vmem>>) attributes {dimension_semantics = [#tpu.dimension_semantics<parallel>, #tpu.dimension_semantics<arbitrary>], iteration_bounds = array<i64: 1, 1>, scalar_prefetch = 0 : i64, scratch_operands = 0 : i64, tpu.core_type = #tpu.core_type<tc>, window_params = [{transform_indices = @transform_0, window_bounds = array<i64: 16, 128>}, {transform_indices = @transform_1, window_bounds = array<i64: 128, 512>}, {transform_indices = @transform_2, window_bounds = array<i64: 1, 512>}, {transform_indices = @transform_3, window_bounds = array<i64: 512, 128>}, {pipeline_mode = #tpu.pipeline_mode<synchronous>, transform_indices = @transform_4, window_bounds = array<i64: 1, 128>}, {transform_indices = @transform_5, window_bounds = array<i64: 16, 128>}]} {
    %c0_i32 = arith.constant 0 : i32
    %0 = arith.cmpi eq, %arg1, %c0_i32 : i32
    %1 = arith.extui %0 : i1 to i32
    %c0_i32_0 = arith.constant 0 : i32
    %2 = arith.cmpi ne, %1, %c0_i32_0 : i32
    scf.if %2 {
      %cst_20 = arith.constant 0.000000e+00 : f32
      %33 = vector.broadcast %cst_20 : f32 to vector<16x128xf32>
      %c0_21 = arith.constant 0 : index
      %c0_22 = arith.constant 0 : index
      %34 = vector.load %arg7[%c0_21, %c0_22] : memref<16x128xf32, #tpu.memory_space<vmem>>, vector<16x128xf32>
      tpu.vector_store %arg7[%c0_21, %c0_22], %33 {strides = array<i32>} : memref<16x128xf32, #tpu.memory_space<vmem>>, vector<16x128xf32>,
    } else {
    }
    %c0 = arith.constant 0 : index
    %c0_1 = arith.constant 0 : index
    %3 = vector.load %arg2[%c0, %c0_1] : memref<16x128xf32, #tpu.memory_space<vmem>>, vector<16x128xf32>
    %4 = arith.truncf %3 : vector<16x128xf32> to vector<16x128xbf16>
    %c0_2 = arith.constant 0 : index
    %c0_3 = arith.constant 0 : index
    %5 = vector.load %arg3[%c0_2, %c0_3] : memref<128x512xbf16, #tpu.memory_space<vmem>>, vector<128x512xbf16>
    %cst = arith.constant dense<0.000000e+00> : vector<16x512xf32>
    %6 = tpu.matmul %4, %5, %cst {dimension_numbers = #tpu.dot_dimension_numbers<[1], [0], [0], [1], [0, 0, 1, 1], [], []>} : vector<16x128xbf16>, vector<128x512xbf16>, vector<16x512xf32> -> vector<16x512xf32>
    %c0_4 = arith.constant 0 : index
    %c0_5 = arith.constant 0 : index
    %7 = vector.load %arg4[%c0_4, %c0_5] : memref<1x512xf32, #tpu.memory_space<vmem>>, vector<1x512xf32>
    %8 = vector.broadcast %7 : vector<1x512xf32> to vector<16x512xf32>
    %9 = arith.addf %6, %8 : vector<16x512xf32>
    %10 = arith.mulf %9, %9 : vector<16x512xf32>
    %cst_6 = arith.constant 5.000000e-01 : f32
    %11 = vector.broadcast %cst_6 : f32 to vector<16x512xf32>
    %12 = arith.mulf %11, %9 : vector<16x512xf32>
    %cst_7 = arith.constant 0.797884583 : f32
    %13 = vector.broadcast %cst_7 : f32 to vector<16x512xf32>
    %14 = arith.mulf %13, %9 : vector<16x512xf32>
    %cst_8 = arith.constant 4.471500e-02 : f32
    %15 = vector.broadcast %cst_8 : f32 to vector<16x512xf32>
    %16 = arith.mulf %15, %10 : vector<16x512xf32>
    %cst_9 = arith.constant 1.000000e+00 : f32
    %17 = vector.broadcast %cst_9 : f32 to vector<16x512xf32>
    %18 = arith.addf %17, %16 : vector<16x512xf32>
    %19 = arith.mulf %14, %18 : vector<16x512xf32>
    %20 = math.tanh %19 : vector<16x512xf32>
    %cst_10 = arith.constant 1.000000e+00 : f32
    %21 = vector.broadcast %cst_10 : f32 to vector<16x512xf32>
    %22 = arith.addf %21, %20 : vector<16x512xf32>
    %23 = arith.mulf %12, %22 : vector<16x512xf32>
    %c0_11 = arith.constant 0 : index
    %c0_12 = arith.constant 0 : index
    %24 = vector.load %arg7[%c0_11, %c0_12] : memref<16x128xf32, #tpu.memory_space<vmem>>, vector<16x128xf32>
    %25 = arith.truncf %23 : vector<16x512xf32> to vector<16x512xbf16>
    %c0_13 = arith.constant 0 : index
    %c0_14 = arith.constant 0 : index
    %26 = vector.load %arg5[%c0_13, %c0_14] : memref<512x128xbf16, #tpu.memory_space<vmem>>, vector<512x128xbf16>
    %cst_15 = arith.constant dense<0.000000e+00> : vector<16x128xf32>
    %27 = tpu.matmul %25, %26, %cst_15 {dimension_numbers = #tpu.dot_dimension_numbers<[1], [0], [0], [1], [0, 0, 1, 1], [], []>} : vector<16x512xbf16>, vector<512x128xbf16>, vector<16x128xf32> -> vector<16x128xf32>
    %28 = arith.addf %24, %27 : vector<16x128xf32>
    %c0_16 = arith.constant 0 : index
    %c0_17 = arith.constant 0 : index
    %29 = vector.load %arg7[%c0_16, %c0_17] : memref<16x128xf32, #tpu.memory_space<vmem>>, vector<16x128xf32>
    tpu.vector_store %arg7[%c0_16, %c0_17], %28 {strides = array<i32>} : memref<16x128xf32, #tpu.memory_space<vmem>>, vector<16x128xf32>,
    %c0_i32_18 = arith.constant 0 : i32
    %30 = arith.cmpi eq, %arg1, %c0_i32_18 : i32
    %31 = arith.extui %30 : i1 to i32
    %c0_i32_19 = arith.constant 0 : i32
    %32 = arith.cmpi ne, %31, %c0_i32_19 : i32
    scf.if %32 {
      %c0_20 = arith.constant 0 : index
      %c0_21 = arith.constant 0 : index
      %33 = vector.load %arg7[%c0_20, %c0_21] : memref<16x128xf32, #tpu.memory_space<vmem>>, vector<16x128xf32>
      %c0_22 = arith.constant 0 : index
      %c0_23 = arith.constant 0 : index
      %34 = vector.load %arg6[%c0_22, %c0_23] : memref<1x128xf32, #tpu.memory_space<vmem>>, vector<1x128xf32>
      %35 = vector.broadcast %34 : vector<1x128xf32> to vector<16x128xf32>
      %36 = arith.addf %33, %35 : vector<16x128xf32>
      %c0_24 = arith.constant 0 : index
      %c0_25 = arith.constant 0 : index
      %37 = vector.load %arg7[%c0_24, %c0_25] : memref<16x128xf32, #tpu.memory_space<vmem>>, vector<16x128xf32>
      tpu.vector_store %arg7[%c0_24, %c0_25], %36 {strides = array<i32>} : memref<16x128xf32, #tpu.memory_space<vmem>>, vector<16x128xf32>,
    } else {
    }
    return
  }
  func.func @transform_0(%arg0: i32, %arg1: i32) -> (i32, i32) {
    %c0_i32 = arith.constant 0 : i32
    %c0_i32_0 = arith.constant 0 : i32
    return %arg0, %c0_i32 : i32, i32
  }
  func.func @transform_1(%arg0: i32, %arg1: i32) -> (i32, i32) {
    %c0_i32 = arith.constant 0 : i32
    %c0_i32_0 = arith.constant 0 : i32
    return %c0_i32, %arg1 : i32, i32
  }
  func.func @transform_2(%arg0: i32, %arg1: i32) -> (i32, i32) {
    %c0_i32 = arith.constant 0 : i32
    %c0_i32_0 = arith.constant 0 : i32
    return %c0_i32, %arg1 : i32, i32
  }
  func.func @transform_3(%arg0: i32, %arg1: i32) -> (i32, i32) {
    %c0_i32 = arith.constant 0 : i32
    %c0_i32_0 = arith.constant 0 : i32
    return %arg1, %c0_i32 : i32, i32
  }
  func.func @transform_4(%arg0: i32, %arg1: i32) -> (i32, i32) {
    %c0_i32 = arith.constant 0 : i32
    %c0_i32_0 = arith.constant 0 : i32
    %c0_i32_1 = arith.constant 0 : i32
    return %c0_i32, %c0_i32_0 : i32, i32
  }
  func.func @transform_5(%arg0: i32, %arg1: i32) -> (i32, i32) {
    %c0_i32 = arith.constant 0 : i32
    %c0_i32_0 = arith.constant 0 : i32
    return %arg0, %c0_i32 : i32, i32
  }
}

</mosaic_0001>

<bundles_post_ra>
// kernel: tpu_custom_call.1
= control target key start
LH: loop header
LB: loop body
LE: loop exit
PB: predicated region body
PF: predicated region fallthrough
CT: control target
= control target key end

     0   :  { %10 = vsyncpa [#allocation3], 0  ;;  %s1261_s0 = inlined_call_operand.hbm [shape: f32[16,128], index: 0, kind: input, shape index: {}]   ;;  %s1262_s1 = inlined_call_operand.hbm [shape: bf16[128,512], index: 1, kind: input, shape index: {}]   ;;  %s1263_s2 = inlined_call_operand.hbm [shape: f32[1,512], index: 2, kind: input, shape index: {}]   ;;  %s1264_s3 = inlined_call_operand.hbm [shape: bf16[512,128], index: 3, kind: input, shape index: {}]   ;;  %s1265_s4 = inlined_call_operand.vmem [shape: f32[1,128], index: 4, kind: input, shape index: {}]   ;;  %s1266_s5 = inlined_call_operand.hbm [shape: f32[16,128], index: 5, kind: output, shape index: {}]  }
   0x1   :  { %11 = vsyncpa [#allocation6], 0 }
   0x2   :  { %12 = vsyncpa [#allocation9], 0 }
   0x3   :  { %13 = vsyncpa [#allocation4], 0  ;;  %s1165_s18 = smov [#allocation5]  }
   0x4   :  { %s31_s19 = sshll.u32 %s1165_s18, 4  ;;  %s32_s19 = int_to_ptr.vmem [resolvable:$true] %s31_s19 }
   0x5   :  { %s1065_s20 = scalar_lea.vmem %s32_s19, 4096  ;;  %p1070_p1 = scmp.lt.s32.totalorder %s32_s19, %s32_s19 }
   0x6   :  { %p1066_p0 = scmp.ne.s32.totalorder %s32_s19, %s1065_s20  ;;  %p1071_p2 = scmp.lt.s32.totalorder %s1065_s20, %s1065_s20 }
   0x8   :  { %p1072_p3 = por %p1071_p2, %p1070_p1 }
   0xa   :  { %p1073_p4 = pnand %p1072_p3, %p1066_p0 }
   0xc   :  { %1076 = shalt.err (!%p1073_p4)
}
   0xd   :  { %s1166_s21 = smov 256   ;;  %s1167_s22 = smov 16  }
   0xe   :  { %37 = dma.hbm_to_vmem [thread:$0]  %s1262_s1, 4096, %s32_s19, [#allocation6], %s1166_s21, %s1166_s21, %s1167_s22  }
   0xf   :  { %s1168_s25 = smov [#allocation2]  }
  0x10   :  { %s19_s26 = sshll.u32 %s1168_s25, 4  ;;  %s20_s26 = int_to_ptr.vmem [resolvable:$true] %s19_s26 }
  0x11   :  { %s1085_s27 = scalar_lea.vmem %s20_s26, 256  ;;  %p1090_p6 = scmp.lt.s32.totalorder %s20_s26, %s20_s26 }
  0x12   :  { %p1086_p5 = scmp.ne.s32.totalorder %s20_s26, %s1085_s27  ;;  %p1091_p7 = scmp.lt.s32.totalorder %s1085_s27, %s1085_s27 }
  0x14   :  { %p1092_p8 = por %p1091_p7, %p1090_p6 }
  0x16   :  { %p1093_p9 = pnand %p1092_p8, %p1086_p5 }
  0x18   :  { %1096 = shalt.err (!%p1093_p9)
}
  0x19   :  { %s1169_s28 = smov 128   ;;  %s1170_s29 = smov 8  }
  0x1a   :  { %25 = dma.hbm_to_vmem [thread:$0]  %s1261_s0, 256, %s20_s26, [#allocation3], %s1169_s28, %s1169_s28, %s1170_s29  }
  0x1b   :  { %s1171_s1 = smov [#allocation7]   ;;  %s1172_s8 = smov [#allocation8]  }
  0x1c   :  { %s44_s7 = sshll.u32 %s1171_s1, 4  ;;  %s53_s9 = sshll.u32 %s1172_s8, 4  ;;  %s45_s7 = int_to_ptr.vmem [resolvable:$true] %s44_s7  ;;  %s54_s9 = int_to_ptr.vmem [resolvable:$true] %s53_s9 }
  0x1d   :  { %s1105_s10 = scalar_lea.vmem %s45_s7, 64  ;;  %p1110_p11 = scmp.lt.s32.totalorder %s45_s7, %s45_s7 }
  0x1e   :  { %p1106_p10 = scmp.ne.s32.totalorder %s45_s7, %s1105_s10  ;;  %p1111_p12 = scmp.lt.s32.totalorder %s1105_s10, %s1105_s10 }
  0x20   :  { %p1112_p13 = por %p1111_p12, %p1110_p11 }
  0x22   :  { %p1113_p0 = pnand %p1112_p13, %p1106_p10 }
  0x24   :  { %1116 = shalt.err (!%p1113_p0)
}
  0x25   :  { %47 = dma.hbm_to_vmem [thread:$0]  %s1263_s2, 64, %s45_s7, [#allocation6]  }
  0x26   :  { %s1125_s13 = scalar_lea.vmem %s54_s9, 4096  ;;  %p1130_p2 = scmp.lt.s32.totalorder %s54_s9, %s54_s9 }
  0x27   :  { %p1126_p1 = scmp.ne.s32.totalorder %s54_s9, %s1125_s13  ;;  %p1131_p3 = scmp.lt.s32.totalorder %s1125_s13, %s1125_s13 }
  0x29   :  { %p1132_p4 = por %p1131_p3, %p1130_p2 }
  0x2b   :  { %p1133_p5 = pnand %p1132_p4, %p1126_p1 }
  0x2d   :  { %1136 = shalt.err (!%p1133_p5)
}
  0x2e   :  { %s1173_s0 = smov 64   ;;  %s1174_s14 = smov 4  }
  0x2f   :  { %59 = dma.hbm_to_vmem [thread:$0]  %s1264_s3, 4096, %s54_s9, [#allocation9], %s1173_s0, %s1173_s0, %s1174_s14  }
  0x30   :  { %1157 = dma.done.wait [#allocation3], 256  }
  0x31   :  { %1158 = vsyncadd [#allocation3], 4294967040 }
  0x32   :  { %1159 = dma.done.wait [#allocation6], 4160  }
  0x33   :  { %1160 = vsyncadd [#allocation6], 4294963136 }
  0x34   :  { %1161 = dma.done.wait [#allocation9], 4096  }
  0x35   :  { %1162 = vsyncadd [#allocation9], 4294963200  ;;  %v1175_v0 = vmov 0   ;;  %v961_v1 = vld [vmem:[#allocation5 + $0xe4] ss:$16 sps:$4 sm:$0xff]   ;;  %v82_v34 = vld [vmem:[#allocation2 + $0x8] sm:$0xff] }
  0x36   :  { %330 = vmatprep.mubr.bf16.mxu0 %v1175_v0  ;;  %373 = vmatprep.mubr.bf16.mxu1 %v1175_v0  ;;  %v963_v2 = vld [vmem:[#allocation5 + $0xec] ss:$16 sps:$4 sm:$0xff]   ;;  %v965_v3 = vld [vmem:[#allocation5 + $0xe0] ss:$16 sps:$4 sm:$0xff]   ;;  %v966_v4 = vld [vmem:[#allocation5 + $0xe8] ss:$16 sps:$4 sm:$0xff]  }
  0x37   :  { %298 = vmatprep.subr.bf16.mxu0 %v961_v1  ;;  %341 = vmatprep.subr.bf16.mxu1 %v963_v2  ;;  %v967_v5 = vld [vmem:[#allocation5 + $0xc4] ss:$16 sps:$4 sm:$0xff]   ;;  %v969_v6 = vld [vmem:[#allocation5 + $0xcc] ss:$16 sps:$4 sm:$0xff]   ;;  %v971_v7 = vld [vmem:[#allocation5 + $0xc0] ss:$16 sps:$4 sm:$0xff]  }
  0x38   :  { %299 = vmatpush1.bf16.msra.mxu0 %v965_v3  ;;  %342 = vmatpush1.bf16.msra.mxu1 %v966_v4  ;;  %v972_v8 = vld [vmem:[#allocation5 + $0xc8] ss:$16 sps:$4 sm:$0xff]   ;;  %v973_v9 = vld [vmem:[#allocation5 + $0xa4] ss:$16 sps:$4 sm:$0xff]   ;;  %v975_v10 = vld [vmem:[#allocation5 + $0xac] ss:$16 sps:$4 sm:$0xff]   ;;  %v118_v4 = vlaneseq }
  0x39   :  { %300 = vmatprep.subr.bf16.mxu0 %v967_v5  ;;  %343 = vmatprep.subr.bf16.mxu1 %v969_v6  ;;  %v977_v11 = vld [vmem:[#allocation5 + $0xa0] ss:$16 sps:$4 sm:$0xff]   ;;  %v978_v12 = vld [vmem:[#allocation5 + $0xa8] ss:$16 sps:$4 sm:$0xff]   ;;  %v979_v13 = vld [vmem:[#allocation5 + $0x84] ss:$16 sps:$4 sm:$0xff]  }
  0x3a   :  { %v981_v14 = vld [vmem:[#allocation5 + $0x8c] ss:$16 sps:$4 sm:$0xff]   ;;  %v983_v15 = vld [vmem:[#allocation5 + $0x80] ss:$16 sps:$4 sm:$0xff]   ;;  %v984_v16 = vld [vmem:[#allocation5 + $0x88] ss:$16 sps:$4 sm:$0xff]  }
  0x3b   :  { %v985_v17 = vld [vmem:[#allocation5 + $0x64] ss:$16 sps:$4 sm:$0xff]   ;;  %v987_v18 = vld [vmem:[#allocation5 + $0x6c] ss:$16 sps:$4 sm:$0xff]   ;;  %v989_v19 = vld [vmem:[#allocation5 + $0x60] ss:$16 sps:$4 sm:$0xff]  }
  0x3c   :  { %301 = vmatpush1.bf16.msra.mxu0 %v971_v7  ;;  %344 = vmatpush1.bf16.msra.mxu1 %v972_v8  ;;  %v990_v20 = vld [vmem:[#allocation5 + $0x68] ss:$16 sps:$4 sm:$0xff]   ;;  %v991_v21 = vld [vmem:[#allocation5 + $0x44] ss:$16 sps:$4 sm:$0xff]   ;;  %v993_v22 = vld [vmem:[#allocation5 + $0x4c] ss:$16 sps:$4 sm:$0xff]  }
  0x3d   :  { %302 = vmatprep.subr.bf16.mxu0 %v973_v9  ;;  %345 = vmatprep.subr.bf16.mxu1 %v975_v10  ;;  %v995_v23 = vld [vmem:[#allocation5 + $0x40] ss:$16 sps:$4 sm:$0xff]   ;;  %v996_v24 = vld [vmem:[#allocation5 + $0x48] ss:$16 sps:$4 sm:$0xff]   ;;  %v997_v25 = vld [vmem:[#allocation5 + $0x24] ss:$16 sps:$4 sm:$0xff]  }
  0x3e   :  { %v999_v26 = vld [vmem:[#allocation5 + $0x2c] ss:$16 sps:$4 sm:$0xff]   ;;  %v1001_v27 = vld [vmem:[#allocation5 + $0x20] ss:$16 sps:$4 sm:$0xff]   ;;  %v1002_v28 = vld [vmem:[#allocation5 + $0x28] ss:$16 sps:$4 sm:$0xff]  }
  0x3f   :  { %v1003_v29 = vld [vmem:[#allocation5 + $0x4] ss:$16 sps:$4 sm:$0xff]   ;;  %v1005_v30 = vld [vmem:[#allocation5 + $0xc] ss:$16 sps:$4 sm:$0xff]   ;;  %v1007_v31 = vld [vmem:[#allocation5] ss:$16 sps:$4 sm:$0xff]  }
  0x40   :  { %303 = vmatpush1.bf16.msra.mxu0 %v977_v11  ;;  %346 = vmatpush1.bf16.msra.mxu1 %v978_v12  ;;  %v1008_v32 = vld [vmem:[#allocation5 + $0x8] ss:$16 sps:$4 sm:$0xff]   ;;  %v81_v33 = vld [vmem:[#allocation2] sm:$0xff]  ;;  %v1009_v36 = vld [vmem:[#allocation8 + $0x78] sm:$0xff]   ;;  %v119_v5 = vshrl.u32 %v118_v4, 7  ;;  %s1176_s17 = smov [#allocation10]  }
  0x41   :  { %304 = vmatprep.subr.bf16.mxu0 %v979_v13  ;;  %347 = vmatprep.subr.bf16.mxu1 %v981_v14  ;;  %v83_v35 = vpack.c.bf16 %v82_v34, %v81_v33  ;;  %v1010_v37 = vld [vmem:[#allocation8 + $0xf8] sm:$0xff]   ;;  %v1013_v40 = vld [vmem:[#allocation8 + $0x70] sm:$0xff]   ;;  %v1017_v44 = vld [vmem:[#allocation8 + $0x68] sm:$0xff]   ;;  %s825_s18 = sshll.u32 %s1176_s17, 4  ;;  %s826_s18 = int_to_ptr.vmem [resolvable:$true] %s825_s18 }
  0x42   :  { %v1011_v38 = vld [vmem:[#allocation8 + $0x38] sm:$0xff]   ;;  %v1014_v41 = vld [vmem:[#allocation8 + $0xf0] sm:$0xff]   ;;  %v1018_v45 = vld [vmem:[#allocation8 + $0xe8] sm:$0xff]   ;;  %v120_v6 = vsub.s32 0, %v119_v5  ;;  %v128_v7 = vsub.s32 2, %v119_v5  ;;  %v124_v9 = vsub.s32 1, %v119_v5  ;;  %p1142_p7 = scmp.lt.s32.totalorder %s826_s18, %s826_s18 }
  0x43   :  { %v1012_v39 = vld [vmem:[#allocation8 + $0xb8] sm:$0xff]   ;;  %v1015_v42 = vld [vmem:[#allocation8 + $0x30] sm:$0xff]   ;;  %v1019_v46 = vld [vmem:[#allocation8 + $0x28] sm:$0xff]   ;;  %v132_v10 = vsub.s32 3, %v119_v5  ;;  %s1137_s19 = scalar_lea.vmem %s826_s18, 256 }
  0x44   :  { %305 = vmatpush1.bf16.msra.mxu0 %v983_v15  ;;  %348 = vmatpush1.bf16.msra.mxu1 %v984_v16  ;;  %v1016_v43 = vld [vmem:[#allocation8 + $0xb0] sm:$0xff]   ;;  %v1020_v47 = vld [vmem:[#allocation8 + $0xa8] sm:$0xff]   ;;  %v1021_v48 = vld [vmem:[#allocation8 + $0x60] sm:$0xff]   ;;  %p1138_p6 = scmp.ne.s32.totalorder %s826_s18, %s1137_s19  ;;  %p1143_p8 = scmp.lt.s32.totalorder %s1137_s19, %s1137_s19 }
  0x45   :  { %306 = vmatprep.subr.bf16.mxu0 %v985_v17  ;;  %349 = vmatprep.subr.bf16.mxu1 %v987_v18  ;;  %v1022_v49 = vld [vmem:[#allocation8 + $0xe0] sm:$0xff]   ;;  %v1025_v52 = vld [vmem:[#allocation8 + $0x58] sm:$0xff]   ;;  %v1029_v56 = vld [vmem:[#allocation8 + $0x50] sm:$0xff]  }
  0x46   :  { %v1023_v50 = vld [vmem:[#allocation8 + $0x20] sm:$0xff]   ;;  %v1026_v53 = vld [vmem:[#allocation8 + $0xd8] sm:$0xff]   ;;  %v1030_v57 = vld [vmem:[#allocation8 + $0xd0] sm:$0xff]   ;;  %p1144_p9 = por %p1143_p8, %p1142_p7 }
  0x47   :  { %v1024_v51 = vld [vmem:[#allocation8 + $0xa0] sm:$0xff]   ;;  %v1027_v54 = vld [vmem:[#allocation8 + $0x18] sm:$0xff]   ;;  %v1031_v58 = vld [vmem:[#allocation8 + $0x10] sm:$0xff]  }
  0x48   :  { %307 = vmatpush1.bf16.msra.mxu0 %v989_v19  ;;  %350 = vmatpush1.bf16.msra.mxu1 %v990_v20  ;;  %v1028_v55 = vld [vmem:[#allocation8 + $0x98] sm:$0xff]   ;;  %v1032_v59 = vld [vmem:[#allocation8 + $0x90] sm:$0xff]   ;;  %v1033_v60 = vld [vmem:[#allocation8 + $0x48] sm:$0xff]   ;;  %p1145_p10 = pnand %p1144_p9, %p1138_p6 }
  0x49   :  { %308 = vmatprep.subr.bf16.mxu0 %v991_v21  ;;  %351 = vmatprep.subr.bf16.mxu1 %v993_v22  ;;  %v1034_v61 = vld [vmem:[#allocation8 + $0xc8] sm:$0xff]   ;;  %v1037_v0 = vld [vmem:[#allocation8 + $0x40] sm:$0xff]   ;;  %v116_v8 = vld [vmem:[#allocation7] sm:$0xf] }
  0x4a   :  { %v1035_v62 = vld [vmem:[#allocation8 + $0x8] sm:$0xff]   ;;  %v1038_v1 = vld [vmem:[#allocation8 + $0xc0] sm:$0xff]   ;;  %v121_v11 = vrot.slane %v116_v8, %v120_v6  ;;  %v129_v12 = vrot.slane %v116_v8, %v128_v7  ;;  %v125_v15 = vrot.slane %v116_v8, %v124_v9  ;;  %v133_v16 = vrot.slane %v116_v8, %v132_v10 }
  0x4b   :  { %v1036_v63 = vld [vmem:[#allocation8 + $0x88] sm:$0xff]   ;;  %v1039_v2 = vld [vmem:[#allocation8] sm:$0xff]  }
  0x4c   :  { %309 = vmatpush1.bf16.msra.mxu0 %v995_v23  ;;  %352 = vmatpush1.bf16.msra.mxu1 %v996_v24  ;;  %v1040_v3 = vld [vmem:[#allocation8 + $0x80] sm:$0xff]  }
  0x4d   :  { %310 = vmatprep.subr.bf16.mxu0 %v997_v25  ;;  %353 = vmatprep.subr.bf16.mxu1 %v999_v26 }
  0x50   :  { %311 = vmatpush1.bf16.msra.mxu0 %v1001_v27  ;;  %354 = vmatpush1.bf16.msra.mxu1 %v1002_v28 }
  0x51   :  { %312 = vmatprep.subr.bf16.mxu0 %v1003_v29  ;;  %355 = vmatprep.subr.bf16.mxu1 %v1005_v30 }
  0x54   :  { %313 = vmatpush1.bf16.msra.mxu0 %v1007_v31  ;;  %356 = vmatpush1.bf16.msra.mxu1 %v1008_v32 }
  0x55   :  { %904 = vmatprep.subr.bf16.mxu0 %v1009_v36  ;;  %926 = vmatprep.subr.bf16.mxu1 %v1010_v37 }
  0x57   :  { %331 = vmatmul.mubr.bf16.vlgmr.msra.gmra.mxu0 %v83_v35  ;;  %374 = vmatmul.mubr.bf16.vlgmr.msra.gmra.mxu1 %v83_v35 }
  0x58   :  { %905 = vmatpush3.bf16.msra.mxu0 %v1011_v38  ;;  %927 = vmatpush3.bf16.msra.mxu1 %v1012_v39 }
  0x59   :  { %906 = vmatprep.subr.bf16.mxu0 %v1013_v40  ;;  %928 = vmatprep.subr.bf16.mxu1 %v1014_v41 }
  0x5c   :  { %907 = vmatpush3.bf16.msra.mxu0 %v1015_v42  ;;  %929 = vmatpush3.bf16.msra.mxu1 %v1016_v43 }
  0x5d   :  { %908 = vmatprep.subr.bf16.mxu0 %v1017_v44  ;;  %930 = vmatprep.subr.bf16.mxu1 %v1018_v45 }
  0x60   :  { %909 = vmatpush3.bf16.msra.mxu0 %v1019_v46  ;;  %931 = vmatpush3.bf16.msra.mxu1 %v1020_v47 }
  0x61   :  { %910 = vmatprep.subr.bf16.mxu0 %v1021_v48  ;;  %932 = vmatprep.subr.bf16.mxu1 %v1022_v49 }
  0x64   :  { %911 = vmatpush3.bf16.msra.mxu0 %v1023_v50  ;;  %933 = vmatpush3.bf16.msra.mxu1 %v1024_v51 }
  0x65   :  { %912 = vmatprep.subr.bf16.mxu0 %v1025_v52  ;;  %934 = vmatprep.subr.bf16.mxu1 %v1026_v53 }
  0x68   :  { %913 = vmatpush3.bf16.msra.mxu0 %v1027_v54  ;;  %935 = vmatpush3.bf16.msra.mxu1 %v1028_v55 }
  0x69   :  { %914 = vmatprep.subr.bf16.mxu0 %v1029_v56  ;;  %936 = vmatprep.subr.bf16.mxu1 %v1030_v57 }
  0x6c   :  { %915 = vmatpush3.bf16.msra.mxu0 %v1031_v58  ;;  %937 = vmatpush3.bf16.msra.mxu1 %v1032_v59 }
  0x6d   :  { %916 = vmatprep.subr.bf16.mxu0 %v1033_v60  ;;  %938 = vmatprep.subr.bf16.mxu1 %v1034_v61 }
  0x70   :  { %917 = vmatpush3.bf16.msra.mxu0 %v1035_v62  ;;  %939 = vmatpush3.bf16.msra.mxu1 %v1036_v63 }
  0x71   :  { %918 = vmatprep.subr.bf16.mxu0 %v1037_v0  ;;  %940 = vmatprep.subr.bf16.mxu1 %v1038_v1 }
  0x74   :  { %919 = vmatpush3.bf16.msra.mxu0 %v1039_v2  ;;  %941 = vmatpush3.bf16.msra.mxu1 %v1040_v3 }
 0x117   :  { %v332_v13 = vpop.f32.mrf.mxu0  ;;  %v375_v14 = vpop.f32.mrf.mxu1 }
 0x118   :  { %v1222_v17 = vadd.f32 %v332_v13, %v121_v11  ;;  %v1224_v18 = vadd.f32 %v375_v14, %v129_v12 }
 0x119   :  { %v334_v19 = vpop.f32.mrf.mxu0  ;;  %v377_v20 = vpop.f32.mrf.mxu1 }
 0x11a   :  { %v384_v21 = vmul.f32 %v1222_v17, %v1222_v17  ;;  %v386_v22 = vmul.f32 %v1224_v18, %v1224_v18  ;;  %v1230_v23 = vadd.f32 %v334_v19, %v125_v15  ;;  %v1232_v24 = vadd.f32 %v377_v20, %v133_v16 }
 0x11b   :  { %v336_v25 = vpop.f32.mrf.mxu0  ;;  %v379_v26 = vpop.f32.mrf.mxu1  ;;  %v400_v38 = vmul.f32 0.7978846, %v1222_v17  ;;  %v402_v48 = vmul.f32 0.7978846, %v1224_v18 }
 0x11c   :  { %v408_v27 = vmul.f32 0.044715, %v384_v21  ;;  %v337_v28 = vadd.f32 %v336_v25, %v121_v11  ;;  %v1234_v29 = vadd.f32 %v379_v26, %v129_v12  ;;  %v410_v30 = vmul.f32 0.044715, %v386_v22 }
 0x11d   :  { %v385_v31 = vmul.f32 %v1230_v23, %v1230_v23  ;;  %v387_v32 = vmul.f32 %v1232_v24, %v1232_v24  ;;  %v338_v37 = vpop.f32.mrf.mxu0  ;;  %v401_v44 = vmul.f32 0.7978846, %v1230_v23  ;;  %v381_v47 = vpop.f32.mrf.mxu1  ;;  %v403_v57 = vmul.f32 0.7978846, %v1232_v24 }
 0x11e   :  { %v416_v33 = vadd.f32 1.0, %v408_v27  ;;  %v388_v36 = vmul.f32 %v337_v28, %v337_v28  ;;  %v390_v39 = vmul.f32 %v1234_v29, %v1234_v29  ;;  %v418_v40 = vadd.f32 1.0, %v410_v30 }
 0x11f   :  { %v409_v34 = vmul.f32 0.044715, %v385_v31  ;;  %v411_v35 = vmul.f32 0.044715, %v387_v32  ;;  %v339_v46 = vadd.f32 %v338_v37, %v125_v15  ;;  %v404_v50 = vmul.f32 0.7978846, %v337_v28 }
 0x120   :  { %v412_v42 = vmul.f32 0.044715, %v388_v36  ;;  %v424_v43 = vmul.f32 %v416_v33, %v400_v38  ;;  %v414_v45 = vmul.f32 0.044715, %v390_v39  ;;  %v406_v53 = vmul.f32 0.7978846, %v1234_v29 }
 0x121   :  { %v417_v41 = vadd.f32 1.0, %v409_v34  ;;  %v419_v49 = vadd.f32 1.0, %v411_v35  ;;  %v389_v55 = vmul.f32 %v339_v46, %v339_v46  ;;  %v426_v56 = vmul.f32 %v418_v40, %v402_v48 }
 0x122   :  { %v420_v51 = vadd.f32 1.0, %v412_v42  ;;  %v422_v54 = vadd.f32 1.0, %v414_v45  ;;  %v382_v59 = vadd.f32 %v381_v47, %v133_v16  ;;  %1041 = vtanh.f32 %v424_v43 }
 0x123   :  { %v425_v52 = vmul.f32 %v417_v41, %v401_v44  ;;  %v413_v61 = vmul.f32 0.044715, %v389_v55  ;;  %v427_v62 = vmul.f32 %v419_v49, %v403_v57  ;;  %v405_v0 = vmul.f32 0.7978846, %v339_v46  ;;  %v903_v55 = vld [vmem:[%s1265_s4] ss:$0 sm:$0xff] }
 0x124   :  { %v428_v58 = vmul.f32 %v420_v51, %v404_v50  ;;  %v430_v60 = vmul.f32 %v422_v54, %v406_v53  ;;  %v391_v63 = vmul.f32 %v382_v59, %v382_v59  ;;  %v407_v4 = vmul.f32 0.7978846, %v382_v59 }
 0x125   :  { %v421_v1 = vadd.f32 1.0, %v413_v61  ;;  %v396_v19 = vmul.f32 0.5, %v337_v28  ;;  %v393_v20 = vmul.f32 0.5, %v1230_v23  ;;  %v397_v22 = vmul.f32 0.5, %v339_v46 }
 0x126   :  { %1043 = vtanh.f32 %v428_v58  ;;  %v415_v2 = vmul.f32 0.044715, %v391_v63  ;;  %v392_v26 = vmul.f32 0.5, %v1222_v17  ;;  %v398_v33 = vmul.f32 0.5, %v1234_v29 }
 0x127   :  { %1045 = vtanh.f32 %v425_v52  ;;  %v429_v3 = vmul.f32 %v421_v1, %v405_v0  ;;  %v395_v37 = vmul.f32 0.5, %v1232_v24  ;;  %v399_v38 = vmul.f32 0.5, %v382_v59 }
 0x128   :  { %1047 = vtanh.f32 %v426_v56  ;;  %v423_v5 = vadd.f32 1.0, %v415_v2  ;;  %v394_v23 = vmul.f32 0.5, %v1224_v18 }
 0x129   :  { %1049 = vtanh.f32 %v430_v60 }
 0x12a   :  { %1051 = vtanh.f32 %v427_v62  ;;  %v431_v6 = vmul.f32 %v423_v5, %v407_v4 }
 0x12b   :  { %1053 = vtanh.f32 %v429_v3 }
 0x12c   :  { %1055 = vtanh.f32 %v431_v6 }
 0x12f   :  { %v1042_v7 = vpop.eup %1041 }
 0x130   :  { %v440_v16 = vadd.f32 1.0, %v1042_v7 }
 0x132   :  { %v448_v36 = vmul.f32 %v440_v16, %v392_v26 }
 0x133   :  { %v1044_v8 = vpop.eup %1043 }
 0x134   :  { %v1046_v9 = vpop.eup %1045  ;;  %v444_v12 = vadd.f32 1.0, %v1044_v8 }
 0x135   :  { %v1048_v10 = vpop.eup %1047  ;;  %v441_v14 = vadd.f32 1.0, %v1046_v9 }
 0x136   :  { %v1050_v11 = vpop.eup %1049  ;;  %v452_v27 = vmul.f32 %v444_v12, %v396_v19  ;;  %v442_v32 = vadd.f32 1.0, %v1048_v10 }
 0x137   :  { %v1052_v13 = vpop.eup %1051  ;;  %v446_v21 = vadd.f32 1.0, %v1050_v11  ;;  %v449_v34 = vmul.f32 %v441_v14, %v393_v20 }
 0x138   :  { %v1054_v15 = vpop.eup %1053  ;;  %v443_v30 = vadd.f32 1.0, %v1052_v13  ;;  %v458_v17 = vpack.c.bf16 %v452_v27, %v448_v36  ;;  %v450_v43 = vmul.f32 %v442_v32, %v394_v23 }
 0x139   :  { %v445_v25 = vadd.f32 1.0, %v1054_v15  ;;  %v1056_v31 = vpop.eup %1055  ;;  %v454_v39 = vmul.f32 %v446_v21, %v398_v33 }
 0x13a   :  { %v447_v28 = vadd.f32 1.0, %v1056_v31  ;;  %v451_v41 = vmul.f32 %v443_v30, %v395_v37 }
 0x13b   :  { %v453_v35 = vmul.f32 %v445_v25, %v397_v22  ;;  %v460_v45 = vpack.c.bf16 %v454_v39, %v450_v43 }
 0x13c   :  { %v455_v42 = vmul.f32 %v447_v28, %v399_v38 }
 0x13d   :  { %v459_v40 = vpack.c.bf16 %v453_v35, %v449_v34 }
 0x13e   :  { %v461_v44 = vpack.c.bf16 %v455_v42, %v451_v41 }
 0x13f   :  { %750 = vmatprep.mubr.bf16.mxu0 %v459_v40 }
 0x140   :  { %751 = vmatmul.mubr.bf16.vlgmr.msra.gmra.mxu0 %v458_v17  ;;  %791 = vmatprep.mubr.bf16.mxu1 %v461_v44 }
 0x141   :  { %792 = vmatmul.mubr.bf16.vlgmr.msra.gmra.mxu1 %v460_v45 }
 0x200   :  { %v920_v29 = vpop.f32.mrf.mxu0 }
 0x201   :  { %v942_v47 = vpop.f32.mrf.mxu1 }
 0x202   :  { %v921_v46 = vpop.f32.mrf.mxu0 }
 0x203   :  { %v922_v24 = vadd.f32 %v921_v46, %v920_v29  ;;  %v943_v49 = vpop.f32.mrf.mxu1 }
 0x204   :  { %v923_v48 = vpop.f32.mrf.mxu0  ;;  %v944_v50 = vadd.f32 %v943_v49, %v942_v47 }
 0x205   :  { %v945_v51 = vpop.f32.mrf.mxu1 }
 0x206   :  { %v924_v18 = vpop.f32.mrf.mxu0  ;;  %v794_v52 = vadd.f32 %v944_v50, %v922_v24 }
 0x207   :  { %v925_v53 = vadd.f32 %v924_v18, %v923_v48  ;;  %v946_v54 = vpop.f32.mrf.mxu1 }
 0x208   :  { %v947_v56 = vadd.f32 %v946_v54, %v945_v51  ;;  %v816_v58 = vadd.f32 %v903_v55, %v794_v52 }
 0x20a   :  { %v797_v57 = vadd.f32 %v947_v56, %v925_v53  ;;  %818 = vst [vmem:[#allocation10] sm:$0xff] %v816_v58 }
 0x20c   :  { %v817_v59 = vadd.f32 %v903_v55, %v797_v57 }
 0x20e   :  { %819 = vst [vmem:[#allocation10 + $0x8] sm:$0xff] %v817_v59 }
 0x20f   :  { %1148 = shalt.err (!%p1145_p10)
}
 0x210   :  { %831 = dma.vmem_to_hbm [thread:$0]  %s826_s18, 256, %s1266_s5, [#allocation4], %s1169_s28, %s1169_s28, %s1170_s29  }
 0x211   :  { %1163 = dma.done.wait [#allocation4], 256  }
 0x212   :  { %1164 = vsyncadd [#allocation4], 4294967040 }
 0x213   :  { %835 = vsyncpa [#allocation3], 1 }
 0x214   :  { %836 = vsyncpa [#allocation6], 1 }
 0x215   :  { %837 = vsyncpa [#allocation9], 1 }
 0x216   :  { %838 = vsyncpa [#allocation4], 1 }

</bundles_post_ra>
